<compile_context>
chip_gen: v5e
topology: v5e:2x2
jax: 0.10.0
libtpu: 0.0.40
codegen_flags: <defaults>
</compile_context>

<pallas_src>
import functools

import jax
import jax.numpy as jnp
from jax.experimental import pallas as pl
from jax.experimental.pallas import tpu as pltpu

HIDDEN = 500          # matches torch.nn.Linear(in_features, 500)
LANE = 128            # TPU lane width
BF16_SUBLANE = 16     # bf16 packs 16 rows per vreg


def _round_up(x: int, m: int) -> int:
    return (x + m - 1) // m * m


def _pad_to(a, shape):
    pads = [(0, t - s) for s, t in zip(a.shape, shape)]
    if all(p == (0, 0) for p in pads):
        return a
    return jnp.pad(a, pads)


def _vmem_capacity_bytes() -> int:
    """Physical VMEM of the current chip (conservative fallback = v7x's 64 MiB)."""
    try:
        return int(pltpu.get_tpu_info().vmem_capacity_bytes)
    except Exception:  # pragma: no cover - defensive
        return 64 << 20


def _vmem_need(tm: int, in_p: int, hid_p: int, out_p: int) -> int:
    """Rough VMEM footprint of one grid step (bytes)."""
    return (2 * tm * in_p * 4          # x tile  (f32, double-buffered)
            + 2 * tm * out_p * 4       # out tile (f32, double-buffered)
            + in_p * hid_p * 2         # W1 bf16 (single-buffered)
            + hid_p * out_p * 2        # W2 bf16 (single-buffered)
            + (hid_p + out_p) * 4      # biases (f32)
            + 2 * tm * hid_p * 4)      # h / relu(h) intermediates (f32)


def _mlp_kernel(x_ref, w1_ref, b1_ref, w2_ref, b2_ref, o_ref):
    """Fused Linear(in_p->hid_p) -> ReLU -> Linear(hid_p->out_p) for one batch tile."""
    x = x_ref[...].astype(jnp.bfloat16)                                  # in-kernel cast (VPU)
    h = jnp.dot(x, w1_ref[...], preferred_element_type=jnp.float32)     # (tm, hid_p) f32
    h = jnp.maximum(h + b1_ref[...], 0.0)                               # bias + ReLU in f32
    y = jnp.dot(h.astype(jnp.bfloat16), w2_ref[...],
                preferred_element_type=jnp.float32)                     # (tm, out_p) f32
    o_ref[...] = (y + b2_ref[...]).astype(o_ref.dtype)


def prepare_params(w1, b1, w2, b2):
    """One-time weight prep (do NOT call per forward).

    Takes PyTorch nn.Linear layouts:
      w1: [500, in_features], b1: [500], w2: [out_features, 500], b2: [out_features]
    Returns a dict of lane-padded, transposed, bf16 weights + f32 biases.
    """
    hid, in_features = w1.shape
    out_features = w2.shape[0]
    assert hid == HIDDEN and w2.shape == (out_features, HIDDEN)
    in_p = _round_up(in_features, LANE)
    hid_p = _round_up(HIDDEN, LANE)          # 500 -> 512
    out_p = _round_up(out_features, LANE)

    return dict(
        w1=_pad_to(w1.T, (in_p, hid_p)).astype(jnp.bfloat16),
        b1=_pad_to(b1.astype(jnp.float32).reshape(1, HIDDEN), (1, hid_p)),
        w2=_pad_to(w2.T, (hid_p, out_p)).astype(jnp.bfloat16),
        b2=_pad_to(b2.astype(jnp.float32).reshape(1, out_features), (1, out_p)),
        out_features=out_features,
    )


@functools.partial(jax.jit, static_argnames=("out_features", "tile_m"))
def my_neural_net_forward(x, w1_p, b1_p, w2_p, b2_p, *, out_features, tile_m=512):
    """Forward pass: relu(x @ W1 + b1) @ W2 + b2 on pre-prepped (padded) weights.

    x: [N, in_features] float.  Returns [N, out_features] float32.
    """
    n, in_features = x.shape
    in_p, hid_p = w1_p.shape
    out_p = w2_p.shape[1]
    assert in_p == _round_up(in_features, LANE)
    assert out_p == _round_up(out_features, LANE)

    # --- batch tile selection ---------------------------------------------------
    if n <= BF16_SUBLANE:
        tm = BF16_SUBLANE
    else:
        # >= 2 grid steps when there is enough batch (v7x megacore), capped at tile_m,
        # rounded to the bf16 sublane multiple.
        tm = min(tile_m, _round_up((n + 1) // 2, BF16_SUBLANE))

    vmem_cap = _vmem_capacity_bytes()
    budget = (vmem_cap * 4) // 5
    while tm > BF16_SUBLANE and _vmem_need(tm, in_p, hid_p, out_p) > budget:
        tm = _round_up(tm // 2, BF16_SUBLANE)

    n_p = _round_up(n, tm)
    grid = (n_p // tm,)

    # x stays f32 in HBM; pad only if actually needed (bf16 cast happens in-kernel).
    x_p = _pad_to(x.astype(jnp.float32), (n_p, in_p))

    need = _vmem_need(tm, in_p, hid_p, out_p)
    vmem_limit = int(min(max(need + need // 2 + (2 << 20), 16 << 20),
                         (vmem_cap * 9) // 10))

    flops = 2 * n_p * (in_p * hid_p + hid_p * out_p)
    bytes_accessed = (n_p * in_p * 4                  # x read (f32)
                      + in_p * hid_p * 2              # W1 (bf16)
                      + hid_p * out_p * 2             # W2 (bf16)
                      + (hid_p + out_p) * 4           # biases
                      + n_p * out_p * 4)              # output write (f32)

    # Grid-invariant operands: DMA'd once, keep a single resident copy.
    invariant = pl.Buffered(buffer_count=1)

    out_padded = pl.pallas_call(
        _mlp_kernel,
        out_shape=jax.ShapeDtypeStruct((n_p, out_p), jnp.float32),
        grid_spec=pltpu.PrefetchScalarGridSpec(
            num_scalar_prefetch=0,
            grid=grid,
            in_specs=[
                pl.BlockSpec((tm, in_p), lambda i: (i, 0)),                              # x tile
                pl.BlockSpec((in_p, hid_p), lambda i: (0, 0), pipeline_mode=invariant),  # W1
                pl.BlockSpec((1, hid_p), lambda i: (0, 0), pipeline_mode=invariant),     # b1
                pl.BlockSpec((hid_p, out_p), lambda i: (0, 0), pipeline_mode=invariant), # W2
                pl.BlockSpec((1, out_p), lambda i: (0, 0), pipeline_mode=invariant),     # b2
            ],
            out_specs=pl.BlockSpec((tm, out_p), lambda i: (i, 0)),
        ),
        compiler_params=pltpu.CompilerParams(
            dimension_semantics=("parallel",),     # batch axis shards across TCs (v7x)
            vmem_limit_bytes=vmem_limit,
        ),
        cost_estimate=pl.CostEstimate(
            flops=int(flops), transcendentals=0, bytes_accessed=int(bytes_accessed)),
    )(x_p, w1_p, b1_p, w2_p, b2_p)

    # Slice padding off only when padding was actually applied.
    if n_p != n or out_p != out_features:
        return out_padded[:n, :out_features]
    return out_padded


def my_neural_net_apply(x, params, tile_m=512):
    """Convenience wrapper over prepared params (see prepare_params)."""
    return my_neural_net_forward(
        x, params["w1"], params["b1"], params["w2"], params["b2"],
        out_features=params["out_features"], tile_m=tile_m)


def init_params(key, in_features, out_features):
    """PyTorch nn.Linear default init: U(-1/sqrt(fan_in), 1/sqrt(fan_in)), torch layouts."""
    k1, k2, k3, k4 = jax.random.split(key, 4)
    bound1 = 1.0 / jnp.sqrt(jnp.float32(in_features))
    bound2 = 1.0 / jnp.sqrt(jnp.float32(HIDDEN))
    w1 = jax.random.uniform(k1, (HIDDEN, in_features), jnp.float32, -bound1, bound1)
    b1 = jax.random.uniform(k2, (HIDDEN,), jnp.float32, -bound1, bound1)
    w2 = jax.random.uniform(k3, (out_features, HIDDEN), jnp.float32, -bound2, bound2)
    b2 = jax.random.uniform(k4, (out_features,), jnp.float32, -bound2, bound2)
    return w1, b1, w2, b2


if __name__ == "__main__":
    in_features = 32
    out_features = 16
    n = 8

    key = jax.random.PRNGKey(0)
    k_x, k_p = jax.random.split(key)
    x = jax.random.normal(k_x, (n, in_features), jnp.float32)
    w1, b1, w2, b2 = init_params(k_p, in_features, out_features)

    # One-time weight prep (transpose / pad / bf16 cast) hoisted out of the forward.
    params = prepare_params(w1, b1, w2, b2)
    params = jax.tree_util.tree_map(
        lambda a: jax.block_until_ready(a) if isinstance(a, jax.Array) else a, params)

    out = my_neural_net_apply(x, params)
    jax.block_until_ready(out)

    # Pure-JAX f32 reference (PyTorch layout: y = relu(x @ W1.T + b1) @ W2.T + b2).
    ref = jnp.maximum(x @ w1.T + b1, 0.0) @ w2.T + b2
    assert out.shape == (n, out_features)
    # bf16 MXU inputs with f32 accumulation -> loosened tolerance vs the f32 reference.
    assert jnp.allclose(out, ref, atol=3e-2, rtol=3e-2), "mismatch vs reference"

    print("KERNEL_OK")
</pallas_src>

<mosaic_0001>
module attributes {stable_mosaic.version = 11 : i64} {
  func.func @_mlp_kernel(%arg0: i32, %arg1: memref<16x128xf32, #tpu.memory_space<vmem>>, %arg2: memref<128x512xbf16, #tpu.memory_space<vmem>>, %arg3: memref<1x512xf32, #tpu.memory_space<vmem>>, %arg4: memref<512x128xbf16, #tpu.memory_space<vmem>>, %arg5: memref<1x128xf32, #tpu.memory_space<vmem>>, %arg6: memref<16x128xf32, #tpu.memory_space<vmem>>) attributes {dimension_semantics = [#tpu.dimension_semantics<parallel>], iteration_bounds = array<i64: 1>, scalar_prefetch = 0 : i64, scratch_operands = 0 : i64, tpu.core_type = #tpu.core_type<tc>, window_params = [{transform_indices = @transform_0, window_bounds = array<i64: 16, 128>}, {pipeline_mode = #tpu.pipeline_mode<synchronous>, transform_indices = @transform_1, window_bounds = array<i64: 128, 512>}, {pipeline_mode = #tpu.pipeline_mode<synchronous>, transform_indices = @transform_2, window_bounds = array<i64: 1, 512>}, {pipeline_mode = #tpu.pipeline_mode<synchronous>, transform_indices = @transform_3, window_bounds = array<i64: 512, 128>}, {pipeline_mode = #tpu.pipeline_mode<synchronous>, transform_indices = @transform_4, window_bounds = array<i64: 1, 128>}, {transform_indices = @transform_5, window_bounds = array<i64: 16, 128>}]} {
    %c0 = arith.constant 0 : index
    %c0_0 = arith.constant 0 : index
    %0 = vector.load %arg1[%c0, %c0_0] : memref<16x128xf32, #tpu.memory_space<vmem>>, vector<16x128xf32>
    %1 = arith.truncf %0 : vector<16x128xf32> to vector<16x128xbf16>
    %c0_1 = arith.constant 0 : index
    %c0_2 = arith.constant 0 : index
    %2 = vector.load %arg2[%c0_1, %c0_2] : memref<128x512xbf16, #tpu.memory_space<vmem>>, vector<128x512xbf16>
    %cst = arith.constant dense<0.000000e+00> : vector<16x512xf32>
    %3 = tpu.matmul %1, %2, %cst {dimension_numbers = #tpu.dot_dimension_numbers<[1], [0], [0], [1], [0, 0, 1, 1], [], []>} : vector<16x128xbf16>, vector<128x512xbf16>, vector<16x512xf32> -> vector<16x512xf32>
    %c0_3 = arith.constant 0 : index
    %c0_4 = arith.constant 0 : index
    %4 = vector.load %arg3[%c0_3, %c0_4] : memref<1x512xf32, #tpu.memory_space<vmem>>, vector<1x512xf32>
    %5 = vector.broadcast %4 : vector<1x512xf32> to vector<16x512xf32>
    %6 = arith.addf %3, %5 : vector<16x512xf32>
    %cst_5 = arith.constant 0.000000e+00 : f32
    %7 = vector.broadcast %cst_5 : f32 to vector<16x512xf32>
    %8 = arith.maximumf %6, %7 : vector<16x512xf32>
    %9 = arith.truncf %8 : vector<16x512xf32> to vector<16x512xbf16>
    %c0_6 = arith.constant 0 : index
    %c0_7 = arith.constant 0 : index
    %10 = vector.load %arg4[%c0_6, %c0_7] : memref<512x128xbf16, #tpu.memory_space<vmem>>, vector<512x128xbf16>
    %cst_8 = arith.constant dense<0.000000e+00> : vector<16x128xf32>
    %11 = tpu.matmul %9, %10, %cst_8 {dimension_numbers = #tpu.dot_dimension_numbers<[1], [0], [0], [1], [0, 0, 1, 1], [], []>} : vector<16x512xbf16>, vector<512x128xbf16>, vector<16x128xf32> -> vector<16x128xf32>
    %c0_9 = arith.constant 0 : index
    %c0_10 = arith.constant 0 : index
    %12 = vector.load %arg5[%c0_9, %c0_10] : memref<1x128xf32, #tpu.memory_space<vmem>>, vector<1x128xf32>
    %13 = vector.broadcast %12 : vector<1x128xf32> to vector<16x128xf32>
    %14 = arith.addf %11, %13 : vector<16x128xf32>
    %c0_11 = arith.constant 0 : index
    %c0_12 = arith.constant 0 : index
    %15 = vector.load %arg6[%c0_11, %c0_12] : memref<16x128xf32, #tpu.memory_space<vmem>>, vector<16x128xf32>
    tpu.vector_store %arg6[%c0_11, %c0_12], %14 {strides = array<i32>} : memref<16x128xf32, #tpu.memory_space<vmem>>, vector<16x128xf32>,
    return
  }
  func.func @transform_0(%arg0: i32) -> (i32, i32) {
    %c0_i32 = arith.constant 0 : i32
    %c0_i32_0 = arith.constant 0 : i32
    return %arg0, %c0_i32 : i32, i32
  }
  func.func @transform_1(%arg0: i32) -> (i32, i32) {
    %c0_i32 = arith.constant 0 : i32
    %c0_i32_0 = arith.constant 0 : i32
    %c0_i32_1 = arith.constant 0 : i32
    return %c0_i32, %c0_i32_0 : i32, i32
  }
  func.func @transform_2(%arg0: i32) -> (i32, i32) {
    %c0_i32 = arith.constant 0 : i32
    %c0_i32_0 = arith.constant 0 : i32
    %c0_i32_1 = arith.constant 0 : i32
    return %c0_i32, %c0_i32_0 : i32, i32
  }
  func.func @transform_3(%arg0: i32) -> (i32, i32) {
    %c0_i32 = arith.constant 0 : i32
    %c0_i32_0 = arith.constant 0 : i32
    %c0_i32_1 = arith.constant 0 : i32
    return %c0_i32, %c0_i32_0 : i32, i32
  }
  func.func @transform_4(%arg0: i32) -> (i32, i32) {
    %c0_i32 = arith.constant 0 : i32
    %c0_i32_0 = arith.constant 0 : i32
    %c0_i32_1 = arith.constant 0 : i32
    return %c0_i32, %c0_i32_0 : i32, i32
  }
  func.func @transform_5(%arg0: i32) -> (i32, i32) {
    %c0_i32 = arith.constant 0 : i32
    %c0_i32_0 = arith.constant 0 : i32
    return %arg0, %c0_i32 : i32, i32
  }
}

</mosaic_0001>

<bundles_post_ra>
// kernel: my_neural_net_forward.1
= control target key start
LH: loop header
LB: loop body
LE: loop exit
PB: predicated region body
PF: predicated region fallthrough
CT: control target
= control target key end

     0   :  { %10 = vsyncpa [#allocation3], 0  ;;  %s1088_s0 = inlined_call_operand.vmem [shape: f32[16,128], index: 0, kind: input, shape index: {}]   ;;  %s1089_s1 = inlined_call_operand.hbm [shape: bf16[128,512], index: 1, kind: input, shape index: {}]   ;;  %s1090_s2 = inlined_call_operand.vmem [shape: f32[1,512], index: 2, kind: input, shape index: {}]   ;;  %s1091_s3 = inlined_call_operand.hbm [shape: bf16[512,128], index: 3, kind: input, shape index: {}]   ;;  %s1092_s4 = inlined_call_operand.vmem [shape: f32[1,128], index: 4, kind: input, shape index: {}]   ;;  %s1093_s5 = inlined_call_operand.vmem [shape: f32[16,128], index: 5, kind: output, shape index: {}]  }
   0x1   :  { %s18_s20 = sshll.u32 %s1089_s1, 4  ;;  %s19_s20 = int_to_ptr.hbm [resolvable:$true] %s18_s20 }
   0x2   :  { %11 = vsyncpa [#allocation5], 0  ;;  %s1028_s21 = smov [#allocation2]   ;;  %s33_s25 = sshll.u32 %s1091_s3, 4  ;;  %s34_s25 = int_to_ptr.hbm [resolvable:$true] %s33_s25 }
   0x3   :  { %s20_s22 = sshll.u32 %s1028_s21, 4  ;;  %s1029_s26 = smov 256   ;;  %s21_s22 = int_to_ptr.vmem [resolvable:$true] %s20_s22 }
   0x4   :  { %s1030_s27 = smov 16   ;;  %s1031_s28 = smov [#allocation4]  }
   0x5   :  { %26 = dma.hbm_to_vmem [thread:$0]  %s19_s20, 4096, %s21_s22, [#allocation3], %s1029_s26, %s1029_s26, %s1030_s27  }
   0x6   :  { %s35_s29 = sshll.u32 %s1031_s28, 4  ;;  %s1032_s30 = smov 64   ;;  %s36_s29 = int_to_ptr.vmem [resolvable:$true] %s35_s29 }
   0x7   :  { %s1033_s6 = smov 4  }
   0x8   :  { %41 = dma.hbm_to_vmem [thread:$0]  %s34_s25, 4096, %s36_s29, [#allocation5], %s1032_s30, %s1032_s30, %s1033_s6  }
   0x9   :  { %1024 = dma.done.wait [#allocation3], 4096  }
   0xa   :  { %1025 = vsyncadd [#allocation3], 4294963200 }
   0xb   :  { %1026 = dma.done.wait [#allocation5], 4096  }
   0xc   :  { %1027 = vsyncadd [#allocation5], 4294963200  ;;  %v763_v0 = vld [vmem:[#allocation2 + $0xe0] sm:$0xf]  ;;  %v935_v1 = vld [vmem:[#allocation2 + $0xec] sm:$0xf0] }
   0xd   :  { %v933_v2 = vld [vmem:[#allocation2 + $0xe4] sm:$0xf]  ;;  %v764_v3 = vor.u32 %v935_v1, %v763_v0  ;;  %v765_v4 = vld [vmem:[#allocation2 + $0xf0] sm:$0xf0]  ;;  %v771_v5 = vld [vmem:[#allocation2 + $0xe8] sm:$0xf] }
   0xe   :  { %v936_v6 = vld [vmem:[#allocation2 + $0xf4] sm:$0xf0]  ;;  %v768_v7 = vor.u32 %v933_v2, %v765_v4  ;;  %v934_v9 = vld [vmem:[#allocation2 + $0xec] sm:$0xf]  ;;  %v773_v10 = vld [vmem:[#allocation2 + $0xf8] sm:$0xf0] }
   0xf   :  { %v772_v8 = vor.u32 %v936_v6, %v771_v5  ;;  %v747_v11 = vld [vmem:[#allocation2 + $0xc0] sm:$0xf]  ;;  %257 = vmatpush.bf16.msra.mxu0 %v764_v3  ;;  %v776_v12 = vor.u32 %v934_v9, %v773_v10  ;;  %v931_v13 = vld [vmem:[#allocation2 + $0xcc] sm:$0xf0]  ;;  %v929_v14 = vld [vmem:[#allocation2 + $0xc4] sm:$0xf] }
  0x10   :  { %v749_v15 = vld [vmem:[#allocation2 + $0xd0] sm:$0xf0]  ;;  %271 = vmatpush.bf16.msra.mxu1 %v768_v7  ;;  %v748_v16 = vor.u32 %v931_v13, %v747_v11  ;;  %v755_v18 = vld [vmem:[#allocation2 + $0xc8] sm:$0xf]  ;;  %v932_v19 = vld [vmem:[#allocation2 + $0xd4] sm:$0xf0] }
  0x11   :  { %285 = vmatpush.bf16.msra.mxu2 %v772_v8  ;;  %v752_v17 = vor.u32 %v929_v14, %v749_v15  ;;  %v930_v20 = vld [vmem:[#allocation2 + $0xcc] sm:$0xf]  ;;  %299 = vmatpush.bf16.msra.mxu3 %v776_v12  ;;  %v756_v21 = vor.u32 %v932_v19, %v755_v18  ;;  %v757_v22 = vld [vmem:[#allocation2 + $0xd8] sm:$0xf0]  ;;  %v731_v23 = vld [vmem:[#allocation2 + $0xa0] sm:$0xf] }
  0x12   :  { %v927_v24 = vld [vmem:[#allocation2 + $0xac] sm:$0xf0]  ;;  %v760_v25 = vor.u32 %v930_v20, %v757_v22  ;;  %v925_v26 = vld [vmem:[#allocation2 + $0xa4] sm:$0xf]  ;;  %v733_v27 = vld [vmem:[#allocation2 + $0xb0] sm:$0xf0] }
  0x13   :  { %v739_v28 = vld [vmem:[#allocation2 + $0xa8] sm:$0xf]  ;;  %258 = vmatpush.bf16.msra.mxu0 %v748_v16  ;;  %v732_v29 = vor.u32 %v927_v24, %v731_v23  ;;  %v928_v30 = vld [vmem:[#allocation2 + $0xb4] sm:$0xf0]  ;;  %v926_v31 = vld [vmem:[#allocation2 + $0xac] sm:$0xf]  ;;  %v736_v33 = vor.u32 %v925_v26, %v733_v27 }
  0x14   :  { %v741_v32 = vld [vmem:[#allocation2 + $0xb8] sm:$0xf0]  ;;  %272 = vmatpush.bf16.msra.mxu1 %v752_v17  ;;  %v740_v34 = vor.u32 %v928_v30, %v739_v28  ;;  %v715_v35 = vld [vmem:[#allocation2 + $0x80] sm:$0xf]  ;;  %v923_v36 = vld [vmem:[#allocation2 + $0x8c] sm:$0xf0] }
  0x15   :  { %286 = vmatpush.bf16.msra.mxu2 %v756_v21  ;;  %v921_v37 = vld [vmem:[#allocation2 + $0x84] sm:$0xf]  ;;  %300 = vmatpush.bf16.msra.mxu3 %v760_v25  ;;  %v744_v38 = vor.u32 %v926_v31, %v741_v32  ;;  %v717_v39 = vld [vmem:[#allocation2 + $0x90] sm:$0xf0]  ;;  %v723_v40 = vld [vmem:[#allocation2 + $0x88] sm:$0xf]  ;;  %v716_v44 = vor.u32 %v923_v36, %v715_v35 }
  0x16   :  { %v924_v41 = vld [vmem:[#allocation2 + $0x94] sm:$0xf0]  ;;  %v922_v42 = vld [vmem:[#allocation2 + $0x8c] sm:$0xf]  ;;  %v725_v43 = vld [vmem:[#allocation2 + $0x98] sm:$0xf0]  ;;  %v720_v45 = vor.u32 %v921_v37, %v717_v39 }
  0x17   :  { %259 = vmatpush.bf16.msra.mxu0 %v732_v29  ;;  %v724_v46 = vor.u32 %v924_v41, %v723_v40  ;;  %v699_v47 = vld [vmem:[#allocation2 + $0x60] sm:$0xf]  ;;  %v919_v48 = vld [vmem:[#allocation2 + $0x6c] sm:$0xf0]  ;;  %v917_v49 = vld [vmem:[#allocation2 + $0x64] sm:$0xf]  ;;  %v728_v50 = vor.u32 %v922_v42, %v725_v43 }
  0x18   :  { %273 = vmatpush.bf16.msra.mxu1 %v736_v33  ;;  %v701_v51 = vld [vmem:[#allocation2 + $0x70] sm:$0xf0]  ;;  %v707_v52 = vld [vmem:[#allocation2 + $0x68] sm:$0xf]  ;;  %v920_v53 = vld [vmem:[#allocation2 + $0x74] sm:$0xf0]  ;;  %v700_v56 = vor.u32 %v919_v48, %v699_v47 }
  0x19   :  { %287 = vmatpush.bf16.msra.mxu2 %v740_v34  ;;  %301 = vmatpush.bf16.msra.mxu3 %v744_v38  ;;  %v918_v54 = vld [vmem:[#allocation2 + $0x6c] sm:$0xf]  ;;  %v709_v55 = vld [vmem:[#allocation2 + $0x78] sm:$0xf0]  ;;  %v704_v57 = vor.u32 %v917_v49, %v701_v51  ;;  %v708_v58 = vor.u32 %v920_v53, %v707_v52  ;;  %v683_v59 = vld [vmem:[#allocation2 + $0x40] sm:$0xf] }
  0x1a   :  { %v915_v60 = vld [vmem:[#allocation2 + $0x4c] sm:$0xf0]  ;;  %v913_v61 = vld [vmem:[#allocation2 + $0x44] sm:$0xf]  ;;  %v712_v62 = vor.u32 %v918_v54, %v709_v55  ;;  %v685_v63 = vld [vmem:[#allocation2 + $0x50] sm:$0xf0] }
  0x1b   :  { %260 = vmatpush.bf16.msra.mxu0 %v716_v44  ;;  %v691_v0 = vld [vmem:[#allocation2 + $0x48] sm:$0xf]  ;;  %v916_v1 = vld [vmem:[#allocation2 + $0x54] sm:$0xf0]  ;;  %v914_v2 = vld [vmem:[#allocation2 + $0x4c] sm:$0xf]  ;;  %v684_v4 = vor.u32 %v915_v60, %v683_v59  ;;  %v688_v5 = vor.u32 %v913_v61, %v685_v63 }
  0x1c   :  { %274 = vmatpush.bf16.msra.mxu1 %v720_v45  ;;  %v693_v3 = vld [vmem:[#allocation2 + $0x58] sm:$0xf0]  ;;  %v692_v6 = vor.u32 %v916_v1, %v691_v0  ;;  %v667_v7 = vld [vmem:[#allocation2 + $0x20] sm:$0xf]  ;;  %v911_v8 = vld [vmem:[#allocation2 + $0x2c] sm:$0xf0] }
  0x1d   :  { %288 = vmatpush.bf16.msra.mxu2 %v724_v46  ;;  %302 = vmatpush.bf16.msra.mxu3 %v728_v50  ;;  %v909_v9 = vld [vmem:[#allocation2 + $0x24] sm:$0xf]  ;;  %v696_v10 = vor.u32 %v914_v2, %v693_v3  ;;  %v669_v11 = vld [vmem:[#allocation2 + $0x30] sm:$0xf0]  ;;  %v675_v12 = vld [vmem:[#allocation2 + $0x28] sm:$0xf]  ;;  %v668_v16 = vor.u32 %v911_v8, %v667_v7 }
  0x1e   :  { %v912_v13 = vld [vmem:[#allocation2 + $0x34] sm:$0xf0]  ;;  %v910_v14 = vld [vmem:[#allocation2 + $0x2c] sm:$0xf]  ;;  %v677_v15 = vld [vmem:[#allocation2 + $0x38] sm:$0xf0]  ;;  %v672_v17 = vor.u32 %v909_v9, %v669_v11 }
  0x1f   :  { %261 = vmatpush.bf16.msra.mxu0 %v700_v56  ;;  %v676_v18 = vor.u32 %v912_v13, %v675_v12  ;;  %v651_v19 = vld [vmem:[#allocation2] sm:$0xf]  ;;  %v907_v20 = vld [vmem:[#allocation2 + $0xc] sm:$0xf0]  ;;  %v905_v21 = vld [vmem:[#allocation2 + $0x4] sm:$0xf]  ;;  %v680_v22 = vor.u32 %v910_v14, %v677_v15 }
  0x20   :  { %275 = vmatpush.bf16.msra.mxu1 %v704_v57  ;;  %v653_v23 = vld [vmem:[#allocation2 + $0x10] sm:$0xf0]  ;;  %v659_v24 = vld [vmem:[#allocation2 + $0x8] sm:$0xf]  ;;  %v908_v25 = vld [vmem:[#allocation2 + $0x14] sm:$0xf0]  ;;  %v652_v28 = vor.u32 %v907_v20, %v651_v19 }
  0x21   :  { %289 = vmatpush.bf16.msra.mxu2 %v708_v58  ;;  %303 = vmatpush.bf16.msra.mxu3 %v712_v62  ;;  %v906_v26 = vld [vmem:[#allocation2 + $0xc] sm:$0xf]  ;;  %v661_v27 = vld [vmem:[#allocation2 + $0x18] sm:$0xf0]  ;;  %v52_v29 = vld [vmem:[%s1088_s0] sm:$0xff]  ;;  %v656_v31 = vor.u32 %v905_v21, %v653_v23  ;;  %v660_v32 = vor.u32 %v908_v25, %v659_v24 }
  0x22   :  { %v53_v30 = vld [vmem:[%s1088_s0 + $0x8] sm:$0xff]  ;;  %v664_v33 = vor.u32 %v906_v26, %v661_v27  ;;  %v944_v34 = vld [vmem:[#allocation4 + $0x38] sm:$0xff]  ;;  %v943_v38 = vld [vmem:[#allocation4 + $0x30] sm:$0xff] }
  0x23   :  { %262 = vmatpush.bf16.msra.mxu0 %v684_v4  ;;  %v54_v35 = vpack.c.bf16 %v53_v30, %v52_v29  ;;  %v952_v36 = vld [vmem:[#allocation4 + $0x78] sm:$0xff]  ;;  %v951_v40 = vld [vmem:[#allocation4 + $0x70] sm:$0xff]  ;;  %v942_v42 = vld [vmem:[#allocation4 + $0x28] sm:$0xff] }
  0x24   :  { %276 = vmatpush.bf16.msra.mxu1 %v688_v5  ;;  %v960_v37 = vld [vmem:[#allocation4 + $0xb8] sm:$0xff]  ;;  %v959_v41 = vld [vmem:[#allocation4 + $0xb0] sm:$0xff]  ;;  %v950_v44 = vld [vmem:[#allocation4 + $0x68] sm:$0xff] }
  0x25   :  { %290 = vmatpush.bf16.msra.mxu2 %v692_v6  ;;  %304 = vmatpush.bf16.msra.mxu3 %v696_v10  ;;  %v968_v39 = vld [vmem:[#allocation4 + $0xf8] sm:$0xff]  ;;  %v967_v43 = vld [vmem:[#allocation4 + $0xf0] sm:$0xff]  ;;  %v958_v45 = vld [vmem:[#allocation4 + $0xa8] sm:$0xff] }
  0x26   :  { %v941_v46 = vld [vmem:[#allocation4 + $0x20] sm:$0xff]  ;;  %v966_v47 = vld [vmem:[#allocation4 + $0xe8] sm:$0xff]  ;;  %v940_v49 = vld [vmem:[#allocation4 + $0x18] sm:$0xff] }
  0x27   :  { %263 = vmatpush.bf16.msra.mxu0 %v668_v16  ;;  %v949_v48 = vld [vmem:[#allocation4 + $0x60] sm:$0xff]  ;;  %v948_v50 = vld [vmem:[#allocation4 + $0x58] sm:$0xff]  ;;  %v939_v53 = vld [vmem:[#allocation4 + $0x10] sm:$0xff] }
  0x28   :  { %277 = vmatpush.bf16.msra.mxu1 %v672_v17  ;;  %v957_v51 = vld [vmem:[#allocation4 + $0xa0] sm:$0xff]  ;;  %v947_v54 = vld [vmem:[#allocation4 + $0x50] sm:$0xff]  ;;  %v956_v55 = vld [vmem:[#allocation4 + $0x98] sm:$0xff] }
  0x29   :  { %291 = vmatpush.bf16.msra.mxu2 %v676_v18  ;;  %305 = vmatpush.bf16.msra.mxu3 %v680_v22  ;;  %v965_v52 = vld [vmem:[#allocation4 + $0xe0] sm:$0xff]  ;;  %v964_v56 = vld [vmem:[#allocation4 + $0xd8] sm:$0xff]  ;;  %v938_v57 = vld [vmem:[#allocation4 + $0x8] sm:$0xff] }
  0x2a   :  { %v946_v58 = vld [vmem:[#allocation4 + $0x48] sm:$0xff]  ;;  %v955_v59 = vld [vmem:[#allocation4 + $0x90] sm:$0xff]  ;;  %v937_v61 = vld [vmem:[#allocation4] sm:$0xff] }
  0x2b   :  { %264 = vmatpush.bf16.msra.mxu0 %v652_v28  ;;  %v963_v60 = vld [vmem:[#allocation4 + $0xd0] sm:$0xff]  ;;  %v945_v62 = vld [vmem:[#allocation4 + $0x40] sm:$0xff]  ;;  %v954_v63 = vld [vmem:[#allocation4 + $0x88] sm:$0xff] }
  0x2c   :  { %278 = vmatpush.bf16.msra.mxu1 %v656_v31  ;;  %v962_v0 = vld [vmem:[#allocation4 + $0xc8] sm:$0xff]  ;;  %v953_v1 = vld [vmem:[#allocation4 + $0x80] sm:$0xff] }
  0x2d   :  { %292 = vmatpush.bf16.msra.mxu2 %v660_v32  ;;  %306 = vmatpush.bf16.msra.mxu3 %v664_v33  ;;  %v961_v2 = vld [vmem:[#allocation4 + $0xc0] sm:$0xff] }
  0x2e   :  { %265 = vmatmul.bf16.vlgmr.msra.gmra.mxu0 %v54_v35  ;;  %v87_v3 = vld [vmem:[%s1090_s2] sm:$0xf] }
  0x2f   :  { %585 = vmatpush.bf16.msrb.mxu0 %v944_v34  ;;  %279 = vmatmul.bf16.vlgmr.msra.gmra.mxu1 %v54_v35  ;;  %v89_v5 = vperm.slane %v87_v3, 0  ;;  %v90_v7 = vperm.slane %v87_v3, 1  ;;  %v91_v17 = vperm.slane %v87_v3, 2  ;;  %v92_v19 = vperm.slane %v87_v3, 3 }
  0x30   :  { %599 = vmatpush.bf16.msrb.mxu1 %v952_v36  ;;  %293 = vmatmul.bf16.vlgmr.msra.gmra.mxu2 %v54_v35 }
  0x31   :  { %307 = vmatmul.bf16.vlgmr.msra.gmra.mxu3 %v54_v35  ;;  %613 = vmatpush.bf16.msrb.mxu2 %v960_v37  ;;  %v975_v37 = vld [vmem:[%s1092_s4] ss:$0 sm:$0xff] }
  0x32   :  { %627 = vmatpush.bf16.msrb.mxu3 %v968_v39 }
  0x33   :  { %586 = vmatpush.bf16.msrb.mxu0 %v943_v38 }
  0x34   :  { %600 = vmatpush.bf16.msrb.mxu1 %v951_v40 }
  0x35   :  { %614 = vmatpush.bf16.msrb.mxu2 %v959_v41 }
  0x36   :  { %628 = vmatpush.bf16.msrb.mxu3 %v967_v43 }
  0x37   :  { %587 = vmatpush.bf16.msrb.mxu0 %v942_v42 }
  0x38   :  { %601 = vmatpush.bf16.msrb.mxu1 %v950_v44 }
  0x39   :  { %615 = vmatpush.bf16.msrb.mxu2 %v958_v45 }
  0x3a   :  { %629 = vmatpush.bf16.msrb.mxu3 %v966_v47 }
  0x3b   :  { %588 = vmatpush.bf16.msrb.mxu0 %v941_v46 }
  0x3c   :  { %602 = vmatpush.bf16.msrb.mxu1 %v949_v48 }
  0x3d   :  { %616 = vmatpush.bf16.msrb.mxu2 %v957_v51 }
  0x3e   :  { %630 = vmatpush.bf16.msrb.mxu3 %v965_v52 }
  0x3f   :  { %589 = vmatpush.bf16.msrb.mxu0 %v940_v49 }
  0x40   :  { %603 = vmatpush.bf16.msrb.mxu1 %v948_v50 }
  0x41   :  { %617 = vmatpush.bf16.msrb.mxu2 %v956_v55 }
  0x42   :  { %631 = vmatpush.bf16.msrb.mxu3 %v964_v56 }
  0x43   :  { %590 = vmatpush.bf16.msrb.mxu0 %v939_v53 }
  0x44   :  { %604 = vmatpush.bf16.msrb.mxu1 %v947_v54 }
  0x45   :  { %618 = vmatpush.bf16.msrb.mxu2 %v955_v59 }
  0x46   :  { %632 = vmatpush.bf16.msrb.mxu3 %v963_v60 }
  0x47   :  { %591 = vmatpush.bf16.msrb.mxu0 %v938_v57 }
  0x48   :  { %605 = vmatpush.bf16.msrb.mxu1 %v946_v58 }
  0x49   :  { %619 = vmatpush.bf16.msrb.mxu2 %v954_v63 }
  0x4a   :  { %633 = vmatpush.bf16.msrb.mxu3 %v962_v0 }
  0x4b   :  { %592 = vmatpush.bf16.msrb.mxu0 %v937_v61 }
  0x4c   :  { %606 = vmatpush.bf16.msrb.mxu1 %v945_v62 }
  0x4d   :  { %620 = vmatpush.bf16.msrb.mxu2 %v953_v1 }
  0x4e   :  { %634 = vmatpush.bf16.msrb.mxu3 %v961_v2 }
  0xab   :  { %v266_v4 = vpop.f32.mrf.mxu0 }
  0xac   :  { %v280_v6 = vpop.f32.mrf.mxu1  ;;  %v267_v8 = vadd.f32 %v266_v4, %v89_v5 }
  0xad   :  { %v281_v9 = vadd.f32 %v280_v6, %v90_v7 }
  0xae   :  { %v313_v13 = vmax.f32 %v267_v8, 0.0 }
  0xaf   :  { %v314_v16 = vmax.f32 %v281_v9, 0.0 }
  0xb3   :  { %v294_v10 = vpop.f32.mrf.mxu2  ;;  %v268_v12 = vpop.f32.mrf.mxu0 }
  0xb4   :  { %v308_v11 = vpop.f32.mrf.mxu3  ;;  %v269_v14 = vadd.f32 %v268_v12, %v89_v5  ;;  %v282_v15 = vpop.f32.mrf.mxu1  ;;  %v295_v23 = vadd.f32 %v294_v10, %v91_v17 }
  0xb5   :  { %v283_v18 = vadd.f32 %v282_v15, %v90_v7  ;;  %v309_v25 = vadd.f32 %v308_v11, %v92_v19 }
  0xb6   :  { %v317_v20 = vmax.f32 %v269_v14, 0.0  ;;  %v315_v30 = vmax.f32 %v295_v23, 0.0 }
  0xb7   :  { %v318_v21 = vmax.f32 %v283_v18, 0.0  ;;  %v316_v32 = vmax.f32 %v309_v25, 0.0 }
  0xb8   :  { %v321_v22 = vpack.c.bf16 %v317_v20, %v313_v13 }
  0xb9   :  { %v322_v24 = vpack.c.bf16 %v318_v21, %v314_v16 }
  0xba   :  { %593 = vmatmul.bf16.vlgmr.msrb.gmra.mxu0 %v321_v22 }
  0xbb   :  { %v296_v26 = vpop.f32.mrf.mxu2  ;;  %607 = vmatmul.bf16.vlgmr.msrb.gmra.mxu1 %v322_v24 }
  0xbc   :  { %v297_v27 = vadd.f32 %v296_v26, %v91_v17  ;;  %v310_v28 = vpop.f32.mrf.mxu3 }
  0xbd   :  { %v311_v29 = vadd.f32 %v310_v28, %v92_v19 }
  0xbe   :  { %v319_v31 = vmax.f32 %v297_v27, 0.0 }
  0xbf   :  { %v320_v33 = vmax.f32 %v311_v29, 0.0 }
  0xc0   :  { %v323_v34 = vpack.c.bf16 %v319_v31, %v315_v30 }
  0xc1   :  { %v324_v35 = vpack.c.bf16 %v320_v33, %v316_v32 }
  0xc2   :  { %621 = vmatmul.bf16.vlgmr.msrb.gmra.mxu2 %v323_v34 }
  0xc3   :  { %635 = vmatmul.bf16.vlgmr.msrb.gmra.mxu3 %v324_v35 }
 0x137   :  { %v594_v36 = vpop.f32.mrf.mxu0 }
 0x138   :  { %v595_v38 = vadd.f32 %v975_v37, %v594_v36  ;;  %v608_v39 = vpop.f32.mrf.mxu1 }
 0x13a   :  { %v609_v40 = vadd.f32 %v608_v39, %v595_v38 }
 0x13f   :  { %v596_v41 = vpop.f32.mrf.mxu0 }
 0x140   :  { %v597_v45 = vadd.f32 %v975_v37, %v596_v41  ;;  %v610_v47 = vpop.f32.mrf.mxu1 }
 0x142   :  { %v611_v48 = vadd.f32 %v610_v47, %v597_v45 }
 0x145   :  { %v622_v42 = vpop.f32.mrf.mxu2 }
 0x146   :  { %v623_v43 = vadd.f32 %v622_v42, %v609_v40  ;;  %v636_v44 = vpop.f32.mrf.mxu3 }
 0x148   :  { %v637_v46 = vadd.f32 %v636_v44, %v623_v43 }
 0x14a   :  { %641 = vst [vmem:[%s1093_s5] sm:$0xff] %v637_v46 }
 0x14d   :  { %v624_v49 = vpop.f32.mrf.mxu2 }
 0x14e   :  { %v625_v50 = vadd.f32 %v624_v49, %v611_v48  ;;  %v638_v51 = vpop.f32.mrf.mxu3 }
 0x150   :  { %v639_v52 = vadd.f32 %v638_v51, %v625_v50 }
 0x152   :  { %642 = vst [vmem:[%s1093_s5 + $0x8] sm:$0xff] %v639_v52 }
 0x153   :  { %647 = vsyncpa [#allocation3], 1 }
 0x154   :  { %648 = vsyncpa [#allocation5], 1 }

</bundles_post_ra>
